<compile_context>
chip_gen: v5e
topology: v5e:2x2
jax: 0.10.0
libtpu: 0.0.40
codegen_flags: <defaults>
</compile_context>

<pallas_src>
import functools
import math

import jax
import jax.numpy as jnp
from jax.experimental import pallas as pl
from jax.experimental.pallas import tpu as pltpu


def _dft_matrices(n: int):
    """Real/imag parts of the n-point DFT matrix W = C - i*S (float32).

    Angles are built from (k*m mod n): k*m itself loses f32 precision for
    n >= ~256, (k*m mod n) stays exactly representable.
    """
    k = jnp.arange(n, dtype=jnp.int32)
    km = (k[:, None] * k[None, :]) % n
    ang = (2.0 * jnp.pi / float(n)) * km.astype(jnp.float32)
    return jnp.cos(ang), jnp.sin(ang)


def _pick_slices_per_step(bc: int, h: int, w: int,
                          in_esize: int, c_esize: int,
                          budget_bytes: int) -> int:
    """How many (H, W) slices to batch per grid step.

    Counts *all* per-slice live VMEM (streamed input blocks incl. double
    buffering + every kernel intermediate), keeps the grid at >= 2 steps when
    B*C allows (v7x megacore), and aligns the fused-matmul M dim (n*H rows) to
    the MXU (256) when that fits, falling back to 8-row sublane alignment.
    """
    per_slice = (2 * 2 * h * w * in_esize            # targets/outputs blocks (x2 buffers)
                 + h * 2 * w * 4                     # stage-1 f32 result
                 + 2 * w * h * (4 + 2 * c_esize)     # transpose (f32) + cast + lane concat
                 + w * 2 * h * 4 * 2)                # stage-2 f32 result + |.|
    cap = max(1, budget_bytes // max(1, per_slice))
    cap = min(cap, bc)
    if bc >= 2:
        cap = min(cap, max(1, bc // 2))              # keep >= 2 grid steps

    align8 = 8 // math.gcd(8, h)                     # smallest n with (n*h) % 8 == 0
    if align8 > cap:
        return bc                                    # single full-array block (always legal)

    n = min(cap, max(align8, -(-512 // h)))          # ~512-row stage-1 stream target
    n = max(align8, (n // align8) * align8)          # sublane-aligned, never exceeds caps

    align256 = 256 // math.gcd(256, h)               # MXU M-alignment (v6e/v7x; /128 on v5e)
    n256 = -(-n // align256) * align256
    if n256 <= cap:
        n = n256
    return n


def _fft_loss_kernel(t_ref, o_ref, ww_ref, wh2_ref, out_ref, *,
                     n_slices, h, w, total_rows, compute_dtype, needs_mask):
    """One grid step: sum_{slices} |Re(fft2(diff))| + |Im(fft2(diff))| reduced over
    the slice batch (leading-axis VPU adds only) into a (W, 2H) partial tile."""
    # Fused diff + cast (and a tail mask if the last block overruns B*C*H rows;
    # jnp.where selects, so any unspecified OOB data is discarded safely).
    x = t_ref[...].astype(jnp.float32) - o_ref[...].astype(jnp.float32)
    if needs_mask:
        row0 = pl.program_id(0) * (n_slices * h)
        rows = jax.lax.broadcasted_iota(jnp.int32, (n_slices * h, 1), 0) + row0
        x = jnp.where(rows < total_rows, x, 0.0)
    x = x.astype(compute_dtype)                                       # (n*h, w)

    # Stage 1: W-side DFT for every row of every slice -> one fused MXU matmul.
    t = jnp.dot(x, ww_ref[...], preferred_element_type=jnp.float32)   # (n*h, 2w) f32

    # Per-slice transpose on the XLU; the C_W/S_W halves now sit on the sublane axis.
    tt = jnp.transpose(t.reshape(n_slices, h, 2 * w), (0, 2, 1))      # (n, 2w, h) f32
    tt = tt.astype(compute_dtype)

    # Place [ (X C_W)^T | (X S_W)^T ] side by side on lanes -> stage-2 K dim = 2H.
    lhs = jnp.concatenate([tt[:, :w, :], tt[:, w:, :]], axis=-1)      # (n, w, 2h)
    lhs = lhs.reshape(n_slices * w, 2 * h)

    # Stage 2: H-side DFT *and* the Re/Im quadrant combination fused in one matmul:
    #   wh2 = [[C_H, S_H], [-S_H, C_H]]  ->  Y = [ Re(fft2)^T | -Im(fft2)^T ]
    y = jnp.dot(lhs, wh2_ref[...], preferred_element_type=jnp.float32)  # (n*w, 2h) f32

    contrib = jnp.abs(y).reshape(n_slices, w, 2 * h)
    out_ref[0] = jnp.sum(contrib, axis=0)                             # (w, 2h) partial


@functools.partial(jax.jit, static_argnames=("reduction", "compute_dtype"))
def fft_loss(targets, outputs, reduction: str = "mean", compute_dtype=jnp.bfloat16):
    """Pallas equivalent of FFT_Loss.forward(targets, outputs)."""
    if reduction not in ("mean", "sum"):
        raise ValueError(f"unsupported reduction: {reduction}")
    assert targets.shape == outputs.shape and targets.ndim == 4
    B, C, H, W = targets.shape
    bc = B * C

    # Generation-aware VMEM budgeting (64 MiB/TC on v7x vs 128 MiB on v5e/v6e).
    try:
        vmem_cap = int(pltpu.get_tpu_info().vmem_capacity_bytes)
    except Exception:
        vmem_cap = 64 * 1024 * 1024
    vmem_limit = min(48 * 1024 * 1024, (vmem_cap * 5) // 8)   # 48 MiB (v5e/v6e), 40 MiB (v7x)

    c_esize = jnp.dtype(compute_dtype).itemsize
    in_esize = jnp.dtype(targets.dtype).itemsize
    # DFT matrices are small and constant-indexed; they are still double-buffered by
    # the pipeline, so count them (x2) in the fixed overhead.  (A pl.Buffered(1)
    # pipeline_mode would reclaim that at large H/W.)
    fixed = 2 * (2 * W * W + 4 * H * H) * c_esize + 2 * (W * 2 * H) * 4
    budget = max(1, vmem_limit // 2 - fixed)

    n_sl = _pick_slices_per_step(bc, H, W, in_esize, c_esize, budget)
    num_steps = -(-bc // n_sl)

    # Stream the raw inputs; subtraction/cast is fused into the kernel (no diff slab).
    t_rows = targets.reshape(bc * H, W)
    o_rows = outputs.reshape(bc * H, W)

    # Stacked DFT matrices (low-precision MXU operands, f32 accumulation).
    ch, sh = _dft_matrices(H)
    cw, sw = _dft_matrices(W)
    ww = jnp.concatenate([cw, sw], axis=1).astype(compute_dtype)            # (W, 2W)
    wh2 = jnp.concatenate(
        [jnp.concatenate([ch, sh], axis=1),
         jnp.concatenate([-sh, ch], axis=1)], axis=0).astype(compute_dtype)  # (2H, 2H)

    kernel = functools.partial(
        _fft_loss_kernel, n_slices=n_sl, h=H, w=W,
        total_rows=bc * H, compute_dtype=compute_dtype,
        needs_mask=(bc % n_sl != 0))

    flops = 4 * bc * H * W * W + 8 * bc * W * H * H
    bytes_accessed = (2 * bc * H * W * in_esize            # streamed targets + outputs
                      + (2 * W * W + 4 * H * H) * c_esize  # DFT matrices
                      + num_steps * W * 2 * H * 4)         # partial outputs

    partials = pl.pallas_call(
        kernel,
        out_shape=jax.ShapeDtypeStruct((num_steps, W, 2 * H), jnp.float32),
        grid_spec=pltpu.PrefetchScalarGridSpec(
            num_scalar_prefetch=0,
            grid=(num_steps,),
            in_specs=[
                pl.BlockSpec((n_sl * H, W), lambda i: (i, 0)),     # targets rows
                pl.BlockSpec((n_sl * H, W), lambda i: (i, 0)),     # outputs rows
                pl.BlockSpec((W, 2 * W), lambda i: (0, 0)),        # [C_W | S_W]
                pl.BlockSpec((2 * H, 2 * H), lambda i: (0, 0)),    # [[C_H,S_H],[-S_H,C_H]]
            ],
            out_specs=pl.BlockSpec((1, W, 2 * H), lambda i: (i, 0, 0)),
        ),
        compiler_params=pltpu.CompilerParams(
            # disjoint per-step outputs -> safe to shard the grid across cores
            dimension_semantics=("parallel",),
            vmem_limit_bytes=vmem_limit,
        ),
        cost_estimate=pl.CostEstimate(
            flops=flops, transcendentals=0, bytes_accessed=bytes_accessed),
    )(t_rows, o_rows, ww, wh2)

    total = jnp.sum(partials)
    if reduction == "mean":
        # F.l1_loss over the stacked (real, imag) tensor: B*C*H*W*2 elements
        return total / jnp.float32(B * C * H * W * 2)
    return total


def _reference_fft_loss(targets, outputs, reduction="mean"):
    """Pure-JAX reference mirroring the PyTorch module."""
    tf = jnp.fft.fft2(targets)
    of = jnp.fft.fft2(outputs)
    t_stack = jnp.stack([tf.real, tf.imag], axis=-1)
    o_stack = jnp.stack([of.real, of.imag], axis=-1)
    diff = jnp.abs(t_stack - o_stack)
    return jnp.mean(diff) if reduction == "mean" else jnp.sum(diff)


if __name__ == "__main__":
    key = jax.random.PRNGKey(0)
    k1, k2 = jax.random.split(key)
    B, C, H, W = 2, 4, 16, 16
    targets = jax.random.normal(k1, (B, C, H, W), dtype=jnp.float32)
    outputs = jax.random.normal(k2, (B, C, H, W), dtype=jnp.float32)

    ref = _reference_fft_loss(targets, outputs, reduction="mean")

    # Default (bf16 MXU operands) path — loosened tolerance vs f32 jnp.fft ref.
    loss = jax.block_until_ready(fft_loss(targets, outputs, reduction="mean"))
    assert jnp.allclose(loss, ref, rtol=2e-2, atol=1e-2), (loss, ref)

    # Full-f32 path — tight tolerance sanity check of the DFT-matmul math.
    loss_f32 = jax.block_until_ready(
        fft_loss(targets, outputs, reduction="mean", compute_dtype=jnp.float32))
    assert jnp.allclose(loss_f32, ref, rtol=1e-4, atol=1e-4), (loss_f32, ref)

    print("KERNEL_OK")
</pallas_src>

<mosaic_0001>
module attributes {stable_mosaic.version = 11 : i64} {
  func.func @_fft_loss_kernel(%arg0: i32, %arg1: memref<64x16xf32, #tpu.memory_space<vmem>>, %arg2: memref<64x16xf32, #tpu.memory_space<vmem>>, %arg3: memref<16x32xbf16, #tpu.memory_space<vmem>>, %arg4: memref<32x32xbf16, #tpu.memory_space<vmem>>, %arg5: memref<1x16x32xf32, #tpu.memory_space<vmem>>) attributes {dimension_semantics = [#tpu.dimension_semantics<parallel>], iteration_bounds = array<i64: 2>, scalar_prefetch = 0 : i64, scratch_operands = 0 : i64, tpu.core_type = #tpu.core_type<tc>, window_params = [{transform_indices = @transform_0, window_bounds = array<i64: 64, 16>}, {transform_indices = @transform_1, window_bounds = array<i64: 64, 16>}, {pipeline_mode = #tpu.pipeline_mode<synchronous>, transform_indices = @transform_2, window_bounds = array<i64: 16, 32>}, {pipeline_mode = #tpu.pipeline_mode<synchronous>, transform_indices = @transform_3, window_bounds = array<i64: 32, 32>}, {transform_indices = @transform_4, window_bounds = array<i64: 1, 16, 32>}]} {
    %c0 = arith.constant 0 : index
    %c0_0 = arith.constant 0 : index
    %0 = vector.load %arg1[%c0, %c0_0] : memref<64x16xf32, #tpu.memory_space<vmem>>, vector<64x16xf32>
    %c0_1 = arith.constant 0 : index
    %c0_2 = arith.constant 0 : index
    %1 = vector.load %arg2[%c0_1, %c0_2] : memref<64x16xf32, #tpu.memory_space<vmem>>, vector<64x16xf32>
    %2 = arith.subf %0, %1 : vector<64x16xf32>
    %3 = arith.truncf %2 : vector<64x16xf32> to vector<64x16xbf16>
    %c0_3 = arith.constant 0 : index
    %c0_4 = arith.constant 0 : index
    %4 = vector.load %arg3[%c0_3, %c0_4] : memref<16x32xbf16, #tpu.memory_space<vmem>>, vector<16x32xbf16>
    %cst = arith.constant dense<0.000000e+00> : vector<64x32xf32>
    %5 = tpu.matmul %3, %4, %cst {dimension_numbers = #tpu.dot_dimension_numbers<[1], [0], [0], [1], [0, 0, 1, 1], [], []>} : vector<64x16xbf16>, vector<16x32xbf16>, vector<64x32xf32> -> vector<64x32xf32>
    %6 = vector.shape_cast %5 : vector<64x32xf32> to vector<4x16x32xf32>
    %7 = tpu.transpose %6, [0, 2, 1] : vector<4x16x32xf32> -> vector<4x32x16xf32>
    %8 = arith.truncf %7 : vector<4x32x16xf32> to vector<4x32x16xbf16>
    %9 = vector.extract_strided_slice %8 {offsets = [0, 0, 0], sizes = [4, 16, 16], strides = [1, 1, 1]} : vector<4x32x16xbf16> to vector<4x16x16xbf16>
    %10 = vector.extract_strided_slice %8 {offsets = [0, 16, 0], sizes = [4, 16, 16], strides = [1, 1, 1]} : vector<4x32x16xbf16> to vector<4x16x16xbf16>
    %11 = tpu.concatenate %9, %10 in 2 : vector<4x16x16xbf16>, vector<4x16x16xbf16> -> vector<4x16x32xbf16>
    %12 = vector.shape_cast %11 : vector<4x16x32xbf16> to vector<64x32xbf16>
    %c0_5 = arith.constant 0 : index
    %c0_6 = arith.constant 0 : index
    %13 = vector.load %arg4[%c0_5, %c0_6] : memref<32x32xbf16, #tpu.memory_space<vmem>>, vector<32x32xbf16>
    %cst_7 = arith.constant dense<0.000000e+00> : vector<64x32xf32>
    %14 = tpu.matmul %12, %13, %cst_7 {dimension_numbers = #tpu.dot_dimension_numbers<[1], [0], [0], [1], [0, 0, 1, 1], [], []>} : vector<64x32xbf16>, vector<32x32xbf16>, vector<64x32xf32> -> vector<64x32xf32>
    %15 = math.absf %14 : vector<64x32xf32>
    %16 = vector.shape_cast %15 : vector<64x32xf32> to vector<4x16x32xf32>
    %cst_8 = arith.constant dense<0.000000e+00> : vector<16x32xf32>
    %17 = vector.multi_reduction <add>, %16, %cst_8 [0] : vector<4x16x32xf32> to vector<16x32xf32>
    %c0_9 = arith.constant 0 : index
    %c0_10 = arith.constant 0 : index
    %c0_11 = arith.constant 0 : index
    %18 = vector.load %arg5[%c0_9, %c0_10, %c0_11] : memref<1x16x32xf32, #tpu.memory_space<vmem>>, vector<1x16x32xf32>
    %19 = vector.shape_cast %18 : vector<1x16x32xf32> to vector<16x32xf32>
    %20 = vector.shape_cast %17 : vector<16x32xf32> to vector<1x16x32xf32>
    tpu.vector_store %arg5[%c0_9, %c0_10, %c0_11], %20 {strides = array<i32>} : memref<1x16x32xf32, #tpu.memory_space<vmem>>, vector<1x16x32xf32>,
    return
  }
  func.func @transform_0(%arg0: i32) -> (i32, i32) {
    %c0_i32 = arith.constant 0 : i32
    %c0_i32_0 = arith.constant 0 : i32
    return %arg0, %c0_i32 : i32, i32
  }
  func.func @transform_1(%arg0: i32) -> (i32, i32) {
    %c0_i32 = arith.constant 0 : i32
    %c0_i32_0 = arith.constant 0 : i32
    return %arg0, %c0_i32 : i32, i32
  }
  func.func @transform_2(%arg0: i32) -> (i32, i32) {
    %c0_i32 = arith.constant 0 : i32
    %c0_i32_0 = arith.constant 0 : i32
    %c0_i32_1 = arith.constant 0 : i32
    return %c0_i32, %c0_i32_0 : i32, i32
  }
  func.func @transform_3(%arg0: i32) -> (i32, i32) {
    %c0_i32 = arith.constant 0 : i32
    %c0_i32_0 = arith.constant 0 : i32
    %c0_i32_1 = arith.constant 0 : i32
    return %c0_i32, %c0_i32_0 : i32, i32
  }
  func.func @transform_4(%arg0: i32) -> (i32, i32, i32) {
    %c0_i32 = arith.constant 0 : i32
    %c0_i32_0 = arith.constant 0 : i32
    %c0_i32_1 = arith.constant 0 : i32
    return %arg0, %c0_i32, %c0_i32_0 : i32, i32, i32
  }
}

</mosaic_0001>

<bundles_post_ra>
// kernel: fft_loss.1
= control target key start
LH: loop header
LB: loop body
LE: loop exit
PB: predicated region body
PF: predicated region fallthrough
CT: control target
= control target key end

     0   :  { %9 = vsyncpa [#allocation3], 0  ;;  %s1173_s0 = inlined_call_operand.hbm [shape: f32[128,16], index: 0, kind: input, shape index: {}]   ;;  %s1174_s1 = inlined_call_operand.hbm [shape: f32[128,16], index: 1, kind: input, shape index: {}]   ;;  %s1175_s2 = inlined_call_operand.vmem [shape: bf16[16,32], index: 2, kind: input, shape index: {}]   ;;  %s1176_s3 = inlined_call_operand.vmem [shape: bf16[32,32], index: 3, kind: input, shape index: {}]   ;;  %s1177_s4 = inlined_call_operand.vmem [shape: f32[2,16,32], index: 4, kind: output, shape index: {}]  }
   0x1   :  { %11 = vsyncpa [#allocation3 + $0x1], 0 }
   0x2   :  { %12 = vsyncpa [#allocation5], 0 }
   0x3   :  { %14 = vsyncpa [#allocation5 + $0x1], 0  ;;  %s984_s15 = smov 0   ;;  %s986_s16 = smov 0  }
   0x4   :  { %s988_s17 = smov 0   ;;  %s990_s18 = smov 0  }
   0x5 LB: > { %s1003_s19 = sadd.s32 4294967295, %s954_s18   ;;  %s1006_s20 = sadd.s32 1, %s954_s18   ;;  %s954_s18 = sphi %s990_s18, %s1185_s18   ;;  %s950_s17 = sphi %s988_s17, %s1184_s17   ;;  %s946_s16 = sphi %s986_s16, %s1183_s16   ;;  %s942_s15 = sphi %s984_s15, %s1182_s15  }
   0x6   : > { %s24_s21 = ssub.s32 %s954_s18, %s1006_s20  ;;  %s27_s22 = sadd.s32 1, %s950_s17 }
   0x7   : > { %p25_p0 = scmp.eq.s32.totalorder %s24_s21, 0  ;;  %p34_p1 = scmp.ne.s32.totalorder %s950_s17, %s946_s16 }
   0x8   : > { %p35_p2 = scmp.eq.s32.totalorder %s954_s18, 0  ;;  %p40_p3 = scmp.ne.s32.totalorder %s946_s16, %s942_s15 }
   0x9   : > { %s1016_s23 = scalar_select %p25_p0, %s950_s17, %s27_s22  }
   0xa   : > { %p1018_p4 = por %p35_p2, %p34_p1  ;;  %p41_p5 = scmp.eq.s32.totalorder %s1003_s19, 0 }
   0xb   : > { %p771_p6 = scmp.lt.s32.totalorder %s954_s18, 2  ;;  %s1029_s26 = sand.u32 1, %s950_s17  }
   0xc   : > { %p1024_p7 = por %p41_p5, %p40_p3  ;;  %s718_s27 = sshll.u32 %s1029_s26, 6 }
   0xd   : > { %s751_s28 = sshll.u32 %s954_s18, 6  ;;  %s168_s6 = scalar_lea.vmem [#allocation2], %s718_s27 }
   0xe   : > { %s173_s5 = scalar_lea.hbm %s1173_s0, %s751_s28  ;;  %s176_s7 = sshll.u32 %s168_s6, 4  ;;  %s177_s7 = int_to_ptr.vmem [resolvable:$true] %s176_s7 }
   0xf   : > { %s174_s8 = sshll.u32 %s173_s5, 4  ;;  %p1042_p8 = pnand %p771_p6, %p1018_p4  ;;  %s175_s8 = int_to_ptr.hbm [resolvable:$true] %s174_s8 }
  0x10   : > { %p724_p9 = scmp.ge.s32.totalorder %s954_s18, 1  ;;  %s165_s10 = scalar_lea.sflag [#allocation3], %s1029_s26 }
  0x11   : > { %s856_s11 = sshra.s32 %s175_s8, 4  ;;  %p860_p11 = pneg %p1042_p8  ;;  %s857_s11 = int_to_ptr.hbm [resolvable:$true] %s856_s11 }
  0x12   : > { %s858_s12 = scalar_lea.hbm %s857_s11, 64  ;;  %s863_s15 = scalar_lea.hbm %s1173_s0, 128 }
  0x13   : > { %p859_p10 = scmp.ne.s32.totalorder %s857_s11, %s858_s12  ;;  %p864_p0 = scmp.lt.s32.totalorder %s857_s11, %s1173_s0 }
  0x14   : > { %p865_p1 = scmp.lt.s32.totalorder %s863_s15, %s858_s12 }
  0x15   : > { %p861_p12 = pnand %p860_p11, %p859_p10 }
  0x16   : > { %p866_p2 = por %p865_p1, %p864_p0 }
  0x17   : > { %p862_p13 = pneg %p861_p12 }
  0x19   : > { %p867_p3 = pnand %p866_p2, %p862_p13 }
  0x1b   : > { %870 = shalt.err (!%p867_p3)
}
  0x1c   : > { %s956_s24 = smov 128   ;;  %s957_s29 = smov 8  }
  0x1d   : > { %767 = dma.hbm_to_vmem [thread:$0]  (!%p1042_p8), %s175_s8, 1024, %s177_s7, %s165_s10, %s956_s24, %s956_s24, %s957_s29  }
  0x1e   : > { %p206_p4 = scmp.lt.s32.totalorder %s954_s18, 3  ;;  %s195_s6 = scalar_lea.hbm %s1174_s1, %s751_s28 }
  0x1f   : > { %s196_s12 = sshll.u32 %s195_s6, 4  ;;  %s190_s13 = scalar_lea.vmem [#allocation4], %s718_s27  ;;  %s197_s12 = int_to_ptr.hbm [resolvable:$true] %s196_s12 }
  0x20   : > { %p1069_p5 = pnand %p724_p9, %p206_p4  ;;  %s198_s14 = sshll.u32 %s190_s13, 4  ;;  %s199_s14 = int_to_ptr.vmem [resolvable:$true] %s198_s14 }
  0x21   : > { %s187_s15 = scalar_lea.sflag [#allocation5], %s1029_s26  ;;  %s886_s21 = sshra.s32 %s197_s12, 4  ;;  %s887_s21 = int_to_ptr.hbm [resolvable:$true] %s886_s21 }
  0x22   : > { %s888_s7 = scalar_lea.hbm %s887_s21, 64  ;;  %s893_s8 = scalar_lea.hbm %s1174_s1, 128 }
  0x23   : > { %p889_p6 = scmp.ne.s32.totalorder %s887_s21, %s888_s7  ;;  %p894_p9 = scmp.lt.s32.totalorder %s887_s21, %s1174_s1 }
  0x24   : > { %p895_p13 = scmp.lt.s32.totalorder %s893_s8, %s888_s7 }
  0x25   : > { %p891_p10 = pnand %p889_p6, %p860_p11 }
  0x26   : > { %p896_p0 = por %p895_p13, %p894_p9 }
  0x27   : > { %p892_p12 = pneg %p891_p10 }
  0x29   : > { %p897_p1 = pnand %p896_p0, %p892_p12 }
  0x2b   : > { %900 = shalt.err (!%p897_p1)
}
  0x2c   : > { %770 = dma.hbm_to_vmem [thread:$0]  (!%p1042_p8), %s197_s12, 1024, %s199_s14, %s187_s15, %s956_s24, %s956_s24, %s957_s29  }
  0x2d   : > { %210 = sbr.rel (%p1069_p5) target bundleno = 685 (0x2ad), region = 36  ;;  %s212_s26 = sand.u32 (!%p1069_p5), 1, %s946_s16  }
  0x2e   : > { %s725_s27 = sshll.u32 (!%p1069_p5), %s212_s26, 6  ;;  %s213_s30 = scalar_lea.sflag (!%p1069_p5), [#allocation3], %s212_s26 }
  0x2f   : > { %s1090_s5 = scalar_lea.vmem (!%p1069_p5), [#allocation2], %s725_s27 }
  0x32   : > { %933 = dma.done.wait (%p1024_p7), %s213_s30, 1024  }
  0x33   : > { %935 = vsyncadd (%p1024_p7), %s213_s30, 4294966272  ;;  %s223_s6 = scalar_lea.sflag [#allocation5], %s212_s26  ;;  %s1096_s13 = scalar_lea.vmem [#allocation4], %s725_s27 }
  0x34   : > { %937 = dma.done.wait (%p1024_p7), %s223_s6, 1024  }
  0x35   : > { %939 = vsyncadd (%p1024_p7), %s223_s6, 4294966272  ;;  %v754_v0 = vld [vmem:[%s1175_s2] sm:$0xff]  ;;  %v267_v1 = vld [vmem:[%s1090_s5 + $0x10] sm:$0xff]  ;;  %vm301_vm0 = vcmask 130048   ;;  %s958_s14 = smov 16   ;;  %vm563_vm1 = vcmask 261120  }
  0x36   : > { %v268_v2 = vld [vmem:[%s1090_s5 + $0x18] sm:$0xff]  ;;  %v275_v3 = vld [vmem:[%s1096_s13 + $0x10] sm:$0xff]  ;;  %757 = vmatpush.bf16.msra.mxu3 %v754_v0  ;;  %321 = vmatpush.bf16.msra.mxu0 %v754_v0  ;;  %v265_v7 = vld [vmem:[%s1090_s5] sm:$0xff]  ;;  %p259_p7 = scmp.lt.s32.totalorder %s1003_s19, 1 }
  0x37   : > { %v276_v4 = vld [vmem:[%s1096_s13 + $0x18] sm:$0xff]  ;;  %v283_v5 = vsub.f32 %v267_v1, %v275_v3  ;;  %v266_v8 = vld [vmem:[%s1090_s5 + $0x8] sm:$0xff]  ;;  %v273_v9 = vld [vmem:[%s1096_s13] sm:$0xff] }
  0x38   : > { %v284_v6 = vsub.f32 %v268_v2, %v276_v4  ;;  %v274_v11 = vld [vmem:[%s1096_s13 + $0x8] sm:$0xff]  ;;  %v281_v12 = vsub.f32 %v265_v7, %v273_v9  ;;  %v269_v15 = vld [vmem:[%s1090_s5 + $0x20] sm:$0xff]  ;;  %v271_v22 = vld [vmem:[%s1090_s5 + $0x30] sm:$0xff]  ;;  %s1187_s19 = smov (!%p259_p7, %s1003_s19), 1 }
  0x39   : > { %v282_v13 = vsub.f32 %v266_v8, %v274_v11  ;;  %v270_v16 = vld [vmem:[%s1090_s5 + $0x28] sm:$0xff]  ;;  %v277_v17 = vld [vmem:[%s1096_s13 + $0x20] sm:$0xff]  ;;  %v272_v23 = vld [vmem:[%s1090_s5 + $0x38] sm:$0xff]  ;;  %s753_s15 = sshll.u32 %s1187_s19, 4 }
  0x3a   : > { %v290_v10 = vpack.c.bf16 %v284_v6, %v283_v5  ;;  %v278_v18 = vld [vmem:[%s1096_s13 + $0x28] sm:$0xff]  ;;  %v285_v19 = vsub.f32 %v269_v15, %v277_v17  ;;  %v279_v24 = vld [vmem:[%s1096_s13 + $0x30] sm:$0xff]  ;;  %v280_v25 = vld [vmem:[%s1096_s13 + $0x38] sm:$0xff]  ;;  %s263_s18 = scalar_lea.vmem %s1177_s4, %s753_s15 }
  0x3b   : > { %v289_v14 = vpack.c.bf16 %v282_v13, %v281_v12  ;;  %v286_v20 = vsub.f32 %v270_v16, %v278_v18  ;;  %v287_v26 = vsub.f32 %v271_v22, %v279_v24  ;;  %v288_v27 = vsub.f32 %v272_v23, %v280_v25  ;;  %v756_v59 = vld [vmem:[%s1176_s3 + $0x8] sm:$0xff]  ;;  %v755_v60 = vld [vmem:[%s1176_s3] sm:$0xff] }
  0x3c   : > { %734 = vmatmul.msk.bf16.vlgmr.msra.gmra.mxu3 %vm301_vm0, %v290_v10  ;;  %758 = vmatpush.bf16.msra.mxu2 %v756_v59 }
  0x3d   : > { %733 = vmatmul.msk.bf16.vlgmr.msra.gmra.mxu0 %vm301_vm0, %v289_v14  ;;  %v291_v21 = vpack.c.bf16 %v286_v20, %v285_v19  ;;  %v292_v28 = vpack.c.bf16 %v288_v27, %v287_v26  ;;  %578 = vmatpush.bf16.msra.mxu1 %v756_v59 }
  0x40   : > { %759 = vmatpush.bf16.msra.mxu2 %v755_v60 }
  0x41   : > { %579 = vmatpush.bf16.msra.mxu1 %v755_v60 }
  0x4c   : > { %735 = vmatmul.msk.bf16.gmra.mxu3 %vm301_vm0, %v291_v21 }
  0x5c   : > { %736 = vmatmul.msk.bf16.gmra.mxu3 %vm301_vm0, %v292_v28 }
  0xba   : > { %v323_v31 = vpop.f32.mrf.mxu0 }
  0xbf   : > { %v328_v29 = vpop.f32.mrf.mxu3 }
  0xc2   : > { %v325_v34 = vpop.f32.mrf.mxu0 }
  0xc7   : > { %v330_v30 = vpop.f32.mrf.mxu3 }
  0xcf   : > { %v333_v32 = vpop.f32.mrf.mxu3 }
  0xd0   : > { %v808_v33 = vpack.i.bf16 %v323_v31, %v333_v32 }
  0xd2   : > { %809 = vxpose.xlu0.b32.start [1/2] (short) (narrow) %v808_v33, 32 }
  0xd7   : > { %v335_v35 = vpop.f32.mrf.mxu3 }
  0xd8   : > { %v810_v36 = vpack.i.bf16 %v325_v34, %v335_v35 }
  0xda   : > { %811 = vxpose.xlu0.b32.end [2/2] (short) (narrow) %v810_v36, 32 }
  0xdf   : > { %v338_v37 = vpop.f32.mrf.mxu3 }
  0xe0   : > { %v832_v38 = vpack.i.bf16 %v328_v29, %v338_v37 }
  0xe2   : > { %833 = vxpose.xlu1.b32.start [1/2] (short) (narrow) %v832_v38, 32 }
  0xe7   : > { %v340_v39 = vpop.f32.mrf.mxu3 }
  0xe8   : > { %v834_v40 = vpack.i.bf16 %v330_v30, %v340_v39 }
  0xea   : > { %835 = vxpose.xlu1.b32.end [2/2] (short) (narrow) %v834_v40, 32 }
 0x176   : > { %v812_v41 = vpop.trf.xlu0 }
 0x177   : > { %v816_v42 = vunpack.i.h.bf16 %v812_v41  ;;  %v813_v43 = vunpack.i.l.bf16 %v812_v41 }
 0x179   : > { %v471_v44 = vpack.c.bf16 %v816_v42, %v816_v42  ;;  %v479_v45 = vpack.c.bf16 %v813_v43, %v813_v43 }
 0x17b   : > { %v495_v49 = vunpack.c.l.b16 %v471_v44  ;;  %v499_v50 = vunpack.c.l.b16 %v479_v45 }
 0x17e   : > { %v817_v46 = vpop.trf.xlu0 }
 0x17f   : > { %v821_v47 = vunpack.i.h.bf16 %v817_v46  ;;  %v818_v48 = vunpack.i.l.bf16 %v817_v46 }
 0x181   : > { %v472_v51 = vpack.c.bf16 %v821_v47, %v821_v47  ;;  %v480_v52 = vpack.c.bf16 %v818_v48, %v818_v48 }
 0x183   : > { %v496_v53 = vunpack.c.l.b16 %v472_v51  ;;  %v500_v54 = vunpack.c.l.b16 %v480_v52 }
 0x185   : > { %v1125_v55 = vpack.c.b16 %v500_v54, %v499_v50  ;;  %v1127_v56 = vpack.c.b16 %v496_v53, %v495_v49 }
 0x186   : > { %v836_v57 = vpop.trf.xlu1  ;;  %v822_v58 = vpop.trf.xlu0 }
 0x187   : > { %v840_v61 = vunpack.i.h.bf16 %v836_v57  ;;  %v837_v62 = vunpack.i.l.bf16 %v836_v57  ;;  %v823_v63 = vunpack.i.l.bf16 %v822_v58  ;;  %v826_v2 = vunpack.i.h.bf16 %v822_v58 }
 0x189   : > { %v475_v0 = vpack.c.bf16 %v840_v61, %v840_v61  ;;  %v483_v1 = vpack.c.bf16 %v837_v62, %v837_v62  ;;  %v481_v5 = vpack.c.bf16 %v823_v63, %v823_v63  ;;  %v473_v18 = vpack.c.bf16 %v826_v2, %v826_v2 }
 0x18b   : > { %v519_v13 = vunpack.c.l.b16 %v481_v5  ;;  %v497_v14 = vunpack.c.l.b16 %v475_v0  ;;  %v501_v15 = vunpack.c.l.b16 %v483_v1  ;;  %v515_v25 = vunpack.c.l.b16 %v473_v18 }
 0x18e   : > { %v841_v3 = vpop.trf.xlu1  ;;  %v827_v4 = vpop.trf.xlu0 }
 0x18f   : > { %v845_v6 = vunpack.i.h.bf16 %v841_v3  ;;  %v842_v7 = vunpack.i.l.bf16 %v841_v3  ;;  %v831_v8 = vunpack.i.h.bf16 %v827_v4  ;;  %v828_v9 = vunpack.i.l.bf16 %v827_v4 }
 0x191   : > { %v476_v10 = vpack.c.bf16 %v845_v6, %v845_v6  ;;  %v484_v11 = vpack.c.bf16 %v842_v7, %v842_v7  ;;  %v482_v12 = vpack.c.bf16 %v828_v9, %v828_v9  ;;  %v474_v19 = vpack.c.bf16 %v831_v8, %v831_v8 }
 0x193   : > { %v498_v16 = vunpack.c.l.b16 %v476_v10  ;;  %v502_v17 = vunpack.c.l.b16 %v484_v11  ;;  %v520_v20 = vunpack.c.l.b16 %v482_v12  ;;  %v516_v26 = vunpack.c.l.b16 %v474_v19 }
 0x195   : > { %v504_v21 = vpack.c.b16 %v498_v16, %v497_v14  ;;  %v506_v22 = vpack.c.b16 %v502_v17, %v501_v15  ;;  %v525_v24 = vpack.c.b16 %v520_v20, %v519_v13  ;;  %v523_v29 = vpack.c.b16 %v516_v26, %v515_v25 }
 0x196   : > { %v846_v23 = vpop.trf.xlu1 }
 0x197   : > { %531 = vrot.lane.b32.xlu2 %v525_v24, %s958_s14  ;;  %v850_v27 = vunpack.i.h.bf16 %v846_v23  ;;  %v847_v28 = vunpack.i.l.bf16 %v846_v23 }
 0x199   : > { %v477_v30 = vpack.c.bf16 %v850_v27, %v850_v27  ;;  %v485_v31 = vpack.c.bf16 %v847_v28, %v847_v28 }
 0x19b   : > { %v517_v37 = vunpack.c.l.b16 %v477_v30  ;;  %v521_v39 = vunpack.c.l.b16 %v485_v31 }
 0x19e   : > { %v851_v32 = vpop.trf.xlu1 }
 0x19f   : > { %v855_v33 = vunpack.i.h.bf16 %v851_v32  ;;  %v852_v34 = vunpack.i.l.bf16 %v851_v32  ;;  %527 = vrot.lane.b32.xlu2 %v523_v29, %s958_s14 }
 0x1a1   : > { %v478_v35 = vpack.c.bf16 %v855_v33, %v855_v33  ;;  %v486_v36 = vpack.c.bf16 %v852_v34, %v852_v34 }
 0x1a3   : > { %v518_v38 = vunpack.c.l.b16 %v478_v35  ;;  %v522_v40 = vunpack.c.l.b16 %v486_v36 }
 0x1a5   : > { %v524_v41 = vpack.c.b16 %v518_v38, %v517_v37  ;;  %v526_v42 = vpack.c.b16 %v522_v40, %v521_v39 }
 0x1a7   : > { %529 = vrot.lane.b32.xlu1 %v524_v41, %s958_s14  ;;  %533 = vrot.lane.b32.xlu0 %v526_v42, %s958_s14 }
 0x1f1   : > { %v532_v43 = vpop.permute.xlu2 %531 }
 0x1f2   : > { %v543_v44 = vsel %vm301_vm0, %v1125_v55, %v532_v43 }
 0x1f3   : > { %747 = vmatmul.msk.bf16.vlgmr.msra.gmra.mxu2 %vm563_vm1, %v543_v44 }
 0x1f9   : > { %v528_v45 = vpop.permute.xlu2 %527 }
 0x1fa   : > { %v537_v46 = vsel %vm301_vm0, %v1127_v56, %v528_v45 }
 0x1fb   : > { %745 = vmatmul.msk.bf16.vlgmr.msra.gmra.mxu1 %vm563_vm1, %v537_v46 }
 0x219   : > { %v530_v47 = vpop.permute.xlu1 %529  ;;  %v534_v48 = vpop.permute.xlu0 %533 }
 0x21a   : > { %v540_v49 = vsel %vm301_vm0, %v504_v21, %v530_v47  ;;  %v546_v50 = vsel %vm301_vm0, %v506_v22, %v534_v48 }
 0x21b   : > { %746 = vmatmul.msk.bf16.gmra.mxu1 %vm563_vm1, %v540_v49  ;;  %748 = vmatmul.msk.bf16.gmra.mxu2 %vm563_vm1, %v546_v50 }
 0x276   : > { %v591_v52 = vpop.f32.mrf.mxu2 }
 0x277   : > { %v605_v58 = vand.u32 2147483647, %v591_v52 }
 0x278   : > { %v581_v51 = vpop.f32.mrf.mxu1 }
 0x279   : > { %v601_v55 = vand.u32 2147483647, %v581_v51  ;;  %v612_v63 = vsel %vm563_vm1, %v605_v58, 0.0 }
 0x27b   : > { %v609_v59 = vsel %vm563_vm1, %v601_v55, 0.0 }
 0x27e   : > { %v593_v54 = vpop.f32.mrf.mxu2 }
 0x27f   : > { %v606_v7 = vand.u32 2147483647, %v593_v54 }
 0x280   : > { %v583_v53 = vpop.f32.mrf.mxu1 }
 0x281   : > { %v602_v0 = vand.u32 2147483647, %v583_v53  ;;  %v619_v12 = vsel %vm563_vm1, %v606_v7, 0.0 }
 0x283   : > { %v616_v8 = vsel %vm563_vm1, %v602_v0, 0.0 }
 0x298   : > { %v586_v56 = vpop.f32.mrf.mxu1 }
 0x299   : > { %v603_v57 = vand.u32 2147483647, %v586_v56 }
 0x29b   : > { %v610_v60 = vsel %vm563_vm1, %v603_v57, 0.0 }
 0x29c   : > { %v611_v61 = vadd.f32 %v610_v60, %v609_v59 }
 0x29e   : > { %v596_v62 = vpop.f32.mrf.mxu2  ;;  %v613_v2 = vadd.f32 %v612_v63, %v611_v61 }
 0x29f   : > { %v607_v1 = vand.u32 2147483647, %v596_v62 }
 0x2a0   : > { %v588_v3 = vpop.f32.mrf.mxu1 }
 0x2a1   : > { %v614_v4 = vsel %vm563_vm1, %v607_v1, 0.0  ;;  %v604_v5 = vand.u32 2147483647, %v588_v3 }
 0x2a2   : > { %v615_v6 = vadd.f32 %v614_v4, %v613_v2 }
 0x2a3   : > { %v617_v9 = vsel %vm563_vm1, %v604_v5, 0.0 }
 0x2a4   : > { %623 = vst.msk [vmem:[%s263_s18] sm:$0xff] %vm563_vm1, %v615_v6  ;;  %v618_v10 = vadd.f32 %v617_v9, %v616_v8 }
 0x2a6   : > { %v598_v11 = vpop.f32.mrf.mxu2  ;;  %v620_v14 = vadd.f32 %v619_v12, %v618_v10 }
 0x2a7   : > { %v608_v13 = vand.u32 2147483647, %v598_v11 }
 0x2a9   : > { %v621_v15 = vsel %vm563_vm1, %v608_v13, 0.0 }
 0x2aa   : > { %v622_v16 = vadd.f32 %v621_v15, %v620_v14 }
 0x2ac   : > { %624 = vst.msk [vmem:[%s263_s18 + $0x8] sm:$0xff] %vm563_vm1, %v622_v16 }
 0x2ad PF: > { %p17_p8 = scmp.ge.s32.totalorder %s1006_s20, 4   ;;  %s1182_s15 = smov %s946_s16 }
 0x2ae   : > { %s1183_s16 = smov %s950_s17  ;;  %s1184_s17 = smov %s1016_s23 }
 0x2af   : > { %s1185_s18 = smov %s1006_s20  ;;  %19 = sbr.rel (!%p17_p8) target bundleno = 5 (0x5), region = 89 }
 0x2b4   :  { %646 = vsyncpa [#allocation3], 1 }
 0x2b5   :  { %648 = vsyncpa [#allocation3 + $0x1], 1 }
 0x2b6   :  { %649 = vsyncpa [#allocation5], 1 }
 0x2b7   :  { %651 = vsyncpa [#allocation5 + $0x1], 1 }

</bundles_post_ra>
